<compile_context>
chip_gen: v7x
topology: tpu7x:2x2x1
jax: 0.10.0
libtpu: 0.0.40
codegen_flags: <defaults>
</compile_context>

<pallas_src>
import functools

import numpy as np
import jax
import jax.numpy as jnp
from jax import lax
from jax.experimental import pallas as pl
from jax.experimental.pallas import tpu as pltpu


# ----------------------------------------------------------------------------
# Fused kernel: BN additive term + roll/mask im2col + single big-K conv matmul.
#   x_ref     : (1, C, HW)        one sample, channels on sublanes, spatial on lanes
#   shift_ref : (C, 1)            (beta - mean*scale) / scale   (scale folded in w)
#   mask_ref  : (KH*KW, 1, HW)    per-tap 0/1 border masks (zero-padding semantics)
#   w_ref     : (Cout, KH*KW*C)   conv weights with BN scale folded in
#   o_ref     : (1, Cout, HW)     conv output (lane-dense spatial axis)
#   col_ref   : (KH*KW*C, HW)     VMEM scratch: im2col matrix (K on sublanes)
# ----------------------------------------------------------------------------
def bn_conv_kernel(x_ref, shift_ref, mask_ref, w_ref, o_ref, col_ref, *,
                   C, H, W, KH, KW, PH, PW, TM):
    HW = H * W
    # BatchNorm (eval): scale is folded into w_ref at trace time, only the
    # per-channel additive term remains -> a single VPU add (no f32 FMA needed).
    xbn = x_ref[0] + shift_ref[...]                                   # (C, HW) f32

    # im2col: col[(kh*KW+kw)*C + c, m] = xbn[c, m + delta] if tap inside the
    # zero-padded image else 0, with delta = (kh-PH)*W + (kw-PW).  The lane
    # roll is static (XLU) and every row of col is fully rewritten each step,
    # so no scratch zeroing is needed.
    for kh in range(KH):
        for kw in range(KW):
            k = kh * KW + kw
            delta = (kh - PH) * W + (kw - PW)
            tap = xbn if delta == 0 else pltpu.roll(xbn, (-delta) % HW, axis=1)
            if not (kh == PH and kw == PW):          # center tap is fully valid
                tap = tap * mask_ref[k]              # (C, HW) * (1, HW)
            col_ref[k * C:(k + 1) * C, :] = tap.astype(col_ref.dtype)

    # One big-K matmul per spatial (lane) tile: (Cout, K) @ (K, TM) -> (Cout, TM)
    # with f32 accumulation; result is stored immediately (no carried accumulator).
    w = w_ref[...]
    for m0 in range(0, HW, TM):
        out_t = jnp.dot(w, col_ref[:, m0:m0 + TM],
                        preferred_element_type=jnp.float32)
        o_ref[0, :, m0:m0 + TM] = out_t.astype(o_ref.dtype)


def basic_quant_conv2d_forward(x, params, *, padding=1, stride=1, eps=1e-3,
                               mxu_dtype=jnp.bfloat16):
    """x: (N, C, H, W) float32 NCHW (PyTorch convention). Returns (N, Cout, H, W)."""
    N, C, H, W = x.shape
    conv_w = params["conv_w"]
    Cout, Cin, KH, KW = conv_w.shape
    assert Cin == C
    PH, PW = (padding, padding) if isinstance(padding, int) else padding
    if stride != 1:
        raise NotImplementedError("stride != 1 not supported")  # TODO(synk)
    HO, WO = H + 2 * PH - KH + 1, W + 2 * PW - KW + 1
    if (HO, WO) != (H, W):
        # TODO(synk): general (non-"same") padding needs the padded-scratch path.
        raise NotImplementedError("only stride-1 'same' convs are supported")
    HW = H * W
    KT = KH * KW * C

    # --- trace-time prep (free layout plumbing, fused by XLA) ----------------
    scale = params["bn_gamma"] / jnp.sqrt(params["bn_var"] + eps)          # (C,)
    shift_os = (params["bn_beta"] / scale - params["bn_mean"])             # shift/scale
    shift_os = shift_os.reshape(C, 1).astype(jnp.float32)
    x_flat = x.reshape(N, C, HW).astype(jnp.float32)                       # free reshape
    # Fold BN scale into the weights; row order matches col rows (kh, kw, c).
    w_fold = conv_w.astype(jnp.float32) * scale[None, :, None, None]
    w_fold = jnp.transpose(w_fold, (0, 2, 3, 1)).reshape(Cout, KT).astype(mxu_dtype)

    # Per-tap 0/1 border masks (numpy constants, reproduce zero-padding semantics).
    ho = np.arange(H)[:, None]
    wo = np.arange(W)[None, :]
    masks = np.empty((KH * KW, 1, HW), np.float32)
    for kh in range(KH):
        for kw in range(KW):
            valid = ((ho + kh - PH >= 0) & (ho + kh - PH < H) &
                     (wo + kw - PW >= 0) & (wo + kw - PW < W))
            masks[kh * KW + kw, 0, :] = valid.astype(np.float32).reshape(HW)
    masks = jnp.asarray(masks)

    # Spatial (lane) tile for the matmul: a divisor of HW, multiple of 128 when
    # possible, bounded so the per-tile result stays small.
    TM = HW
    for cand in (512, 256, 128):
        if HW % cand == 0:
            TM = cand
            break

    kernel = functools.partial(bn_conv_kernel, C=C, H=H, W=W, KH=KH, KW=KW,
                               PH=PH, PW=PW, TM=TM)

    itm = jnp.dtype(mxu_dtype).itemsize
    # Rough per-step VMEM need (double-buffered blocks + im2col scratch).
    vmem_est = (2 * (C * HW * 4 + C * 4 + KH * KW * HW * 4
                     + Cout * KT * itm + Cout * HW * 4)
                + KT * HW * itm + (2 << 20))
    flops = 2 * N * HW * KT * Cout
    bytes_accessed = (4 * N * C * HW + Cout * KT * itm
                      + 4 * KH * KW * HW + 4 * N * Cout * HW)

    out = pl.pallas_call(
        kernel,
        out_shape=jax.ShapeDtypeStruct((N, Cout, HW), jnp.float32),
        grid=(N,),
        in_specs=[
            pl.BlockSpec((1, C, HW), lambda n: (n, 0, 0)),        # x (per sample)
            pl.BlockSpec((C, 1), lambda n: (0, 0)),               # BN additive term
            pl.BlockSpec((KH * KW, 1, HW), lambda n: (0, 0, 0)),  # border masks
            pl.BlockSpec((Cout, KT), lambda n: (0, 0)),           # folded weights
        ],
        out_specs=pl.BlockSpec((1, Cout, HW), lambda n: (n, 0, 0)),
        scratch_shapes=[pltpu.VMEM((KT, HW), mxu_dtype)],         # im2col buffer
        compiler_params=pltpu.CompilerParams(
            dimension_semantics=("parallel",),
            vmem_limit_bytes=int(max(32 * 1024 * 1024, vmem_est))),
        cost_estimate=pl.CostEstimate(flops=flops, transcendentals=0,
                                      bytes_accessed=bytes_accessed),
    )(x_flat, shift_os, masks, w_fold)

    return out.reshape(N, Cout, H, W)   # free reshape; no slice, no transpose


def reference_forward(x, params, *, padding=1, eps=1e-3):
    """Pure-JAX reference replicating the PyTorch forward (eval mode)."""
    scale = params["bn_gamma"] / jnp.sqrt(params["bn_var"] + eps)
    shift = params["bn_beta"] - params["bn_mean"] * scale
    xb = x * scale[None, :, None, None] + shift[None, :, None, None]
    return lax.conv_general_dilated(
        xb, params["conv_w"], window_strides=(1, 1),
        padding=[(padding, padding), (padding, padding)],
        dimension_numbers=("NCHW", "OIHW", "NCHW"),
        precision=lax.Precision.HIGHEST)


def make_params(key, in_channels, out_channels, kernel_size):
    ks = jax.random.split(key, 5)
    return {
        "bn_gamma": 1.0 + 0.1 * jax.random.normal(ks[0], (in_channels,), jnp.float32),
        "bn_beta": 0.1 * jax.random.normal(ks[1], (in_channels,), jnp.float32),
        "bn_mean": 0.05 * jax.random.normal(ks[2], (in_channels,), jnp.float32),
        "bn_var": 0.5 + jax.random.uniform(ks[3], (in_channels,), jnp.float32),
        "conv_w": 0.1 * jax.random.normal(
            ks[4], (out_channels, in_channels, kernel_size, kernel_size), jnp.float32),
    }


if __name__ == "__main__":
    key = jax.random.PRNGKey(0)
    kx, kp, kx2, kp2 = jax.random.split(key, 4)

    # --- 3x3 conv, padding=1 (typical BasicQuantConv2d usage) ----------------
    N, C, H, W = 2, 16, 16, 16
    Cout, K, pad = 32, 3, 1
    x = jax.random.normal(kx, (N, C, H, W), jnp.float32)
    params = make_params(kp, C, Cout, K)
    ref = reference_forward(x, params, padding=pad)

    # f32 MXU operands: tight check.
    out_f32 = basic_quant_conv2d_forward(x, params, padding=pad,
                                         mxu_dtype=jnp.float32)
    out_f32 = jax.block_until_ready(out_f32)
    assert out_f32.shape == (N, Cout, H, W)
    np.testing.assert_allclose(np.asarray(out_f32), np.asarray(ref),
                               rtol=2e-3, atol=2e-3)

    # Default bf16 MXU operands (f32 accumulation / f32 BN math): looser check.
    out_bf16 = basic_quant_conv2d_forward(x, params, padding=pad)
    out_bf16 = jax.block_until_ready(out_bf16)
    np.testing.assert_allclose(np.asarray(out_bf16), np.asarray(ref),
                               rtol=6e-2, atol=6e-2)

    # --- 1x1 conv, padding=0 (other common usage) -----------------------------
    N2, C2, H2, W2 = 3, 32, 16, 16
    Cout2, K2, pad2 = 64, 1, 0
    x2 = jax.random.normal(kx2, (N2, C2, H2, W2), jnp.float32)
    params2 = make_params(kp2, C2, Cout2, K2)
    ref2 = reference_forward(x2, params2, padding=pad2)

    out2 = basic_quant_conv2d_forward(x2, params2, padding=pad2,
                                      mxu_dtype=jnp.float32)
    out2 = jax.block_until_ready(out2)
    assert out2.shape == (N2, Cout2, H2, W2)
    np.testing.assert_allclose(np.asarray(out2), np.asarray(ref2),
                               rtol=2e-3, atol=2e-3)

    print("KERNEL_OK")
</pallas_src>

<mosaic_0001>
module attributes {stable_mosaic.version = 11 : i64} {
  func.func @bn_conv_kernel(%arg0: i32, %arg1: memref<1x16x256xf32, #tpu.memory_space<vmem>>, %arg2: memref<16x1xf32, #tpu.memory_space<vmem>>, %arg3: memref<9x1x256xf32, #tpu.memory_space<vmem>>, %arg4: memref<32x144xf32, #tpu.memory_space<vmem>>, %arg5: memref<1x32x256xf32, #tpu.memory_space<vmem>>, %arg6: memref<144x256xf32, #tpu.memory_space<vmem>>) attributes {dimension_semantics = [#tpu.dimension_semantics<parallel>], iteration_bounds = array<i64: 2>, scalar_prefetch = 0 : i64, scratch_operands = 1 : i64, tpu.core_type = #tpu.core_type<tc>, window_params = [{transform_indices = @transform_0, window_bounds = array<i64: 1, 16, 256>}, {pipeline_mode = #tpu.pipeline_mode<synchronous>, transform_indices = @transform_1, window_bounds = array<i64: 16, 1>}, {pipeline_mode = #tpu.pipeline_mode<synchronous>, transform_indices = @transform_2, window_bounds = array<i64: 9, 1, 256>}, {pipeline_mode = #tpu.pipeline_mode<synchronous>, transform_indices = @transform_3, window_bounds = array<i64: 32, 144>}, {transform_indices = @transform_4, window_bounds = array<i64: 1, 32, 256>}]} {
    %c0 = arith.constant 0 : index
    %c0_0 = arith.constant 0 : index
    %c0_1 = arith.constant 0 : index
    %0 = vector.load %arg1[%c0, %c0_0, %c0_1] : memref<1x16x256xf32, #tpu.memory_space<vmem>>, vector<1x16x256xf32>
    %1 = vector.shape_cast %0 : vector<1x16x256xf32> to vector<16x256xf32>
    %c0_2 = arith.constant 0 : index
    %c0_3 = arith.constant 0 : index
    %2 = vector.load %arg2[%c0_2, %c0_3] : memref<16x1xf32, #tpu.memory_space<vmem>>, vector<16x1xf32>
    %3 = vector.broadcast %2 : vector<16x1xf32> to vector<16x256xf32>
    %4 = arith.addf %1, %3 : vector<16x256xf32>
    %c17_i32 = arith.constant 17 : i32
    %5 = tpu.dynamic_rotate %4 by %c17_i32 dim 1 : vector<16x256xf32>, i32 -> vector<16x256xf32>
    %c0_4 = arith.constant 0 : index
    %c0_5 = arith.constant 0 : index
    %c0_6 = arith.constant 0 : index
    %6 = vector.load %arg3[%c0_4, %c0_5, %c0_6] : memref<9x1x256xf32, #tpu.memory_space<vmem>>, vector<1x1x256xf32>
    %7 = vector.shape_cast %6 : vector<1x1x256xf32> to vector<1x256xf32>
    %8 = vector.broadcast %7 : vector<1x256xf32> to vector<16x256xf32>
    %9 = arith.mulf %5, %8 : vector<16x256xf32>
    %c0_7 = arith.constant 0 : index
    %c0_8 = arith.constant 0 : index
    %10 = vector.load %arg6[%c0_7, %c0_8] : memref<144x256xf32, #tpu.memory_space<vmem>>, vector<16x256xf32>
    tpu.vector_store %arg6[%c0_7, %c0_8], %9 {strides = array<i32>} : memref<144x256xf32, #tpu.memory_space<vmem>>, vector<16x256xf32>,
    %c16_i32 = arith.constant 16 : i32
    %11 = tpu.dynamic_rotate %4 by %c16_i32 dim 1 : vector<16x256xf32>, i32 -> vector<16x256xf32>
    %c1 = arith.constant 1 : index
    %c0_9 = arith.constant 0 : index
    %c0_10 = arith.constant 0 : index
    %12 = vector.load %arg3[%c1, %c0_9, %c0_10] : memref<9x1x256xf32, #tpu.memory_space<vmem>>, vector<1x1x256xf32>
    %13 = vector.shape_cast %12 : vector<1x1x256xf32> to vector<1x256xf32>
    %14 = vector.broadcast %13 : vector<1x256xf32> to vector<16x256xf32>
    %15 = arith.mulf %11, %14 : vector<16x256xf32>
    %c16 = arith.constant 16 : index
    %c0_11 = arith.constant 0 : index
    %16 = vector.load %arg6[%c16, %c0_11] : memref<144x256xf32, #tpu.memory_space<vmem>>, vector<16x256xf32>
    tpu.vector_store %arg6[%c16, %c0_11], %15 {strides = array<i32>} : memref<144x256xf32, #tpu.memory_space<vmem>>, vector<16x256xf32>,
    %c15_i32 = arith.constant 15 : i32
    %17 = tpu.dynamic_rotate %4 by %c15_i32 dim 1 : vector<16x256xf32>, i32 -> vector<16x256xf32>
    %c2 = arith.constant 2 : index
    %c0_12 = arith.constant 0 : index
    %c0_13 = arith.constant 0 : index
    %18 = vector.load %arg3[%c2, %c0_12, %c0_13] : memref<9x1x256xf32, #tpu.memory_space<vmem>>, vector<1x1x256xf32>
    %19 = vector.shape_cast %18 : vector<1x1x256xf32> to vector<1x256xf32>
    %20 = vector.broadcast %19 : vector<1x256xf32> to vector<16x256xf32>
    %21 = arith.mulf %17, %20 : vector<16x256xf32>
    %c32 = arith.constant 32 : index
    %c0_14 = arith.constant 0 : index
    %22 = vector.load %arg6[%c32, %c0_14] : memref<144x256xf32, #tpu.memory_space<vmem>>, vector<16x256xf32>
    tpu.vector_store %arg6[%c32, %c0_14], %21 {strides = array<i32>} : memref<144x256xf32, #tpu.memory_space<vmem>>, vector<16x256xf32>,
    %c1_i32 = arith.constant 1 : i32
    %23 = tpu.dynamic_rotate %4 by %c1_i32 dim 1 : vector<16x256xf32>, i32 -> vector<16x256xf32>
    %c3 = arith.constant 3 : index
    %c0_15 = arith.constant 0 : index
    %c0_16 = arith.constant 0 : index
    %24 = vector.load %arg3[%c3, %c0_15, %c0_16] : memref<9x1x256xf32, #tpu.memory_space<vmem>>, vector<1x1x256xf32>
    %25 = vector.shape_cast %24 : vector<1x1x256xf32> to vector<1x256xf32>
    %26 = vector.broadcast %25 : vector<1x256xf32> to vector<16x256xf32>
    %27 = arith.mulf %23, %26 : vector<16x256xf32>
    %c48 = arith.constant 48 : index
    %c0_17 = arith.constant 0 : index
    %28 = vector.load %arg6[%c48, %c0_17] : memref<144x256xf32, #tpu.memory_space<vmem>>, vector<16x256xf32>
    tpu.vector_store %arg6[%c48, %c0_17], %27 {strides = array<i32>} : memref<144x256xf32, #tpu.memory_space<vmem>>, vector<16x256xf32>,
    %c64 = arith.constant 64 : index
    %c0_18 = arith.constant 0 : index
    %29 = vector.load %arg6[%c64, %c0_18] : memref<144x256xf32, #tpu.memory_space<vmem>>, vector<16x256xf32>
    tpu.vector_store %arg6[%c64, %c0_18], %4 {strides = array<i32>} : memref<144x256xf32, #tpu.memory_space<vmem>>, vector<16x256xf32>,
    %c255_i32 = arith.constant 255 : i32
    %30 = tpu.dynamic_rotate %4 by %c255_i32 dim 1 : vector<16x256xf32>, i32 -> vector<16x256xf32>
    %c5 = arith.constant 5 : index
    %c0_19 = arith.constant 0 : index
    %c0_20 = arith.constant 0 : index
    %31 = vector.load %arg3[%c5, %c0_19, %c0_20] : memref<9x1x256xf32, #tpu.memory_space<vmem>>, vector<1x1x256xf32>
    %32 = vector.shape_cast %31 : vector<1x1x256xf32> to vector<1x256xf32>
    %33 = vector.broadcast %32 : vector<1x256xf32> to vector<16x256xf32>
    %34 = arith.mulf %30, %33 : vector<16x256xf32>
    %c80 = arith.constant 80 : index
    %c0_21 = arith.constant 0 : index
    %35 = vector.load %arg6[%c80, %c0_21] : memref<144x256xf32, #tpu.memory_space<vmem>>, vector<16x256xf32>
    tpu.vector_store %arg6[%c80, %c0_21], %34 {strides = array<i32>} : memref<144x256xf32, #tpu.memory_space<vmem>>, vector<16x256xf32>,
    %c241_i32 = arith.constant 241 : i32
    %36 = tpu.dynamic_rotate %4 by %c241_i32 dim 1 : vector<16x256xf32>, i32 -> vector<16x256xf32>
    %c6 = arith.constant 6 : index
    %c0_22 = arith.constant 0 : index
    %c0_23 = arith.constant 0 : index
    %37 = vector.load %arg3[%c6, %c0_22, %c0_23] : memref<9x1x256xf32, #tpu.memory_space<vmem>>, vector<1x1x256xf32>
    %38 = vector.shape_cast %37 : vector<1x1x256xf32> to vector<1x256xf32>
    %39 = vector.broadcast %38 : vector<1x256xf32> to vector<16x256xf32>
    %40 = arith.mulf %36, %39 : vector<16x256xf32>
    %c96 = arith.constant 96 : index
    %c0_24 = arith.constant 0 : index
    %41 = vector.load %arg6[%c96, %c0_24] : memref<144x256xf32, #tpu.memory_space<vmem>>, vector<16x256xf32>
    tpu.vector_store %arg6[%c96, %c0_24], %40 {strides = array<i32>} : memref<144x256xf32, #tpu.memory_space<vmem>>, vector<16x256xf32>,
    %c240_i32 = arith.constant 240 : i32
    %42 = tpu.dynamic_rotate %4 by %c240_i32 dim 1 : vector<16x256xf32>, i32 -> vector<16x256xf32>
    %c7 = arith.constant 7 : index
    %c0_25 = arith.constant 0 : index
    %c0_26 = arith.constant 0 : index
    %43 = vector.load %arg3[%c7, %c0_25, %c0_26] : memref<9x1x256xf32, #tpu.memory_space<vmem>>, vector<1x1x256xf32>
    %44 = vector.shape_cast %43 : vector<1x1x256xf32> to vector<1x256xf32>
    %45 = vector.broadcast %44 : vector<1x256xf32> to vector<16x256xf32>
    %46 = arith.mulf %42, %45 : vector<16x256xf32>
    %c112 = arith.constant 112 : index
    %c0_27 = arith.constant 0 : index
    %47 = vector.load %arg6[%c112, %c0_27] : memref<144x256xf32, #tpu.memory_space<vmem>>, vector<16x256xf32>
    tpu.vector_store %arg6[%c112, %c0_27], %46 {strides = array<i32>} : memref<144x256xf32, #tpu.memory_space<vmem>>, vector<16x256xf32>,
    %c239_i32 = arith.constant 239 : i32
    %48 = tpu.dynamic_rotate %4 by %c239_i32 dim 1 : vector<16x256xf32>, i32 -> vector<16x256xf32>
    %c8 = arith.constant 8 : index
    %c0_28 = arith.constant 0 : index
    %c0_29 = arith.constant 0 : index
    %49 = vector.load %arg3[%c8, %c0_28, %c0_29] : memref<9x1x256xf32, #tpu.memory_space<vmem>>, vector<1x1x256xf32>
    %50 = vector.shape_cast %49 : vector<1x1x256xf32> to vector<1x256xf32>
    %51 = vector.broadcast %50 : vector<1x256xf32> to vector<16x256xf32>
    %52 = arith.mulf %48, %51 : vector<16x256xf32>
    %c128 = arith.constant 128 : index
    %c0_30 = arith.constant 0 : index
    %53 = vector.load %arg6[%c128, %c0_30] : memref<144x256xf32, #tpu.memory_space<vmem>>, vector<16x256xf32>
    tpu.vector_store %arg6[%c128, %c0_30], %52 {strides = array<i32>} : memref<144x256xf32, #tpu.memory_space<vmem>>, vector<16x256xf32>,
    %c0_31 = arith.constant 0 : index
    %c0_32 = arith.constant 0 : index
    %54 = vector.load %arg4[%c0_31, %c0_32] : memref<32x144xf32, #tpu.memory_space<vmem>>, vector<32x144xf32>
    %c0_33 = arith.constant 0 : index
    %c0_34 = arith.constant 0 : index
    %55 = vector.load %arg6[%c0_33, %c0_34] : memref<144x256xf32, #tpu.memory_space<vmem>>, vector<144x256xf32>
    %cst = arith.constant dense<0.000000e+00> : vector<32x256xf32>
    %56 = tpu.matmul %54, %55, %cst {dimension_numbers = #tpu.dot_dimension_numbers<[1], [0], [0], [1], [0, 0, 1, 1], [], []>} : vector<32x144xf32>, vector<144x256xf32>, vector<32x256xf32> -> vector<32x256xf32>
    %c0_35 = arith.constant 0 : index
    %c0_36 = arith.constant 0 : index
    %c0_37 = arith.constant 0 : index
    %57 = vector.load %arg5[%c0_35, %c0_36, %c0_37] : memref<1x32x256xf32, #tpu.memory_space<vmem>>, vector<1x32x256xf32>
    %58 = vector.shape_cast %57 : vector<1x32x256xf32> to vector<32x256xf32>
    %59 = vector.shape_cast %56 : vector<32x256xf32> to vector<1x32x256xf32>
    tpu.vector_store %arg5[%c0_35, %c0_36, %c0_37], %59 {strides = array<i32>} : memref<1x32x256xf32, #tpu.memory_space<vmem>>, vector<1x32x256xf32>,
    return
  }
  func.func @transform_0(%arg0: i32) -> (i32, i32, i32) {
    %c0_i32 = arith.constant 0 : i32
    %c0_i32_0 = arith.constant 0 : i32
    %c0_i32_1 = arith.constant 0 : i32
    return %arg0, %c0_i32, %c0_i32_0 : i32, i32, i32
  }
  func.func @transform_1(%arg0: i32) -> (i32, i32) {
    %c0_i32 = arith.constant 0 : i32
    %c0_i32_0 = arith.constant 0 : i32
    %c0_i32_1 = arith.constant 0 : i32
    return %c0_i32, %c0_i32_0 : i32, i32
  }
  func.func @transform_2(%arg0: i32) -> (i32, i32, i32) {
    %c0_i32 = arith.constant 0 : i32
    %c0_i32_0 = arith.constant 0 : i32
    %c0_i32_1 = arith.constant 0 : i32
    %c0_i32_2 = arith.constant 0 : i32
    return %c0_i32, %c0_i32_0, %c0_i32_1 : i32, i32, i32
  }
  func.func @transform_3(%arg0: i32) -> (i32, i32) {
    %c0_i32 = arith.constant 0 : i32
    %c0_i32_0 = arith.constant 0 : i32
    %c0_i32_1 = arith.constant 0 : i32
    return %c0_i32, %c0_i32_0 : i32, i32
  }
  func.func @transform_4(%arg0: i32) -> (i32, i32, i32) {
    %c0_i32 = arith.constant 0 : i32
    %c0_i32_0 = arith.constant 0 : i32
    %c0_i32_1 = arith.constant 0 : i32
    return %arg0, %c0_i32, %c0_i32_0 : i32, i32, i32
  }
}

</mosaic_0001>

<bundles_post_ra>
// kernel: tpu_custom_call.1
= control target key start
LH: loop header
LB: loop body
LE: loop exit
PB: predicated region body
PF: predicated region fallthrough
CT: control target
= control target key end

     0   :  { %9 = vsyncpa [#allocation4], 0  ;;  %s1427_s0 = inlined_call_operand.hbm [shape: f32[2,16,256], index: 0, kind: input, shape index: {}]   ;;  %s1428_s1 = inlined_call_operand.vmem [shape: f32[16,1], index: 1, kind: input, shape index: {}]   ;;  %s1429_s2 = inlined_call_operand.vmem [shape: f32[9,1,256], index: 2, kind: input, shape index: {}]   ;;  %s1430_s3 = inlined_call_operand.hbm [shape: f32[32,144], index: 3, kind: input, shape index: {}]   ;;  %s1431_s4 = inlined_call_operand.hbm [shape: f32[2,32,256], index: 4, kind: output, shape index: {}]  }
   0x1   :  { %11 = vsyncpa [#allocation4 + $0x1], 0 }
   0x2   :  { %12 = vsyncpa [#allocation7], 0 }
   0x3   :  { %13 = vsyncpa [#allocation5], 0 }
   0x4   :  { %15 = vsyncpa [#allocation5 + $0x1], 0  ;;  %s1102_s15 = smov 0   ;;  %s1104_s16 = smov 0  }
   0x5   :  { %s1106_s17 = smov 0   ;;  %s1108_s18 = smov 0  }
   0x6 LB: > { %s1123_s19 = sadd.s32 4294967295, %s1060_s18   ;;  %s779_s20 = sadd.s32 4294967294, %s1060_s18   ;;  %s1060_s18 = sphi %s1108_s18, %s1451_s18   ;;  %s1056_s17 = sphi %s1106_s17, %s1450_s17   ;;  %s1052_s16 = sphi %s1104_s16, %s1449_s16   ;;  %s1048_s15 = sphi %s1102_s15, %s1448_s15  }
   0x7   : > { %p41_p0 = scmp.ne.s32.totalorder %s1052_s16, %s1048_s15  ;;  %p1432_p1 = scmp.eq.s32.totalorder %s1123_s19, 0 }
   0x8   : > { %p134_p3 = scmp.eq.s32.totalorder %s779_s20, 1  ;;  %p780_p5 = scmp.ge.s32.totalorder %s1060_s18, 1 }
   0x9   : > { %p1132_p4 = por %p1432_p1, %p41_p0  ;;  %p141_p7 = scmp.lt.s32.totalorder %s1060_s18, 3 }
   0xa   : > { %p1137_p6 = por %p134_p3, %p41_p0  ;;  %s1062_s24 = smov [#allocation6]  }
   0xb   : > { %s1435_s21 = scalar_select %p1132_p4, 1, 0 }
   0xc   : > { %s1436_s22 = scalar_select %p1137_p6, 1, 0 }
   0xd   : > { %p1142_p8 = pnand %p780_p5, %p141_p7  ;;  %s159_s25 = sshll.u32 %s1062_s24, 4  ;;  %s1146_s25 = int_to_ptr.vmem [resolvable:$true] %s159_s25 }
   0xe   : > { %s1158_s27 = sadd.s32 1, %s1060_s18   ;;  %s28_s28 = sadd.s32 1, %s1056_s17 }
   0xf   : > { %s1437_s23 = scalar_select %p1142_p8, 1, 0 }
  0x10   : > { %p870_p9 = pneg %p1142_p8  ;;  %s25_s29 = ssub.s32 %s1060_s18, %s1158_s27 }
  0x11   : > { %s932_s6 = scalar_lea.hbm %s1430_s3, 1024 }
  0x12   : > { %p1153_p11 = pnand %p870_p9, %p1432_p1  ;;  %p933_p12 = scmp.ne.s32.totalorder %s1430_s3, %s932_s6 }
  0x13   : > { %p939_p5 = scmp.lt.u32.totalorder %s932_s6, %s1430_s3 }
  0x14   : > { %p934_p13 = pneg %p1153_p11 }
  0x16   : > { %p935_p0 = pnand %p934_p13, %p933_p12 }
  0x18   : > { %p936_p3 = pneg %p935_p0 }
  0x1a   : > { %p941_p7 = pnand %p939_p5, %p936_p3 }
  0x1c   : > { %944 = shalt.err (!%p941_p7)
}
  0x1d   : > { %s945_s11 = scalar_lea.vmem %s1146_s25, 1024  ;;  %p953_p2 = scmp.lt.s32.totalorder %s1146_s25, %s1146_s25 }
  0x1e   : > { %p946_p9 = scmp.ne.s32.totalorder %s1146_s25, %s945_s11  ;;  %p954_p6 = scmp.lt.s32.totalorder %s945_s11, %s945_s11 }
  0x20   : > { %p948_p10 = pnand %p946_p9, %p934_p13  ;;  %p955_p4 = por %p954_p6, %p953_p2 }
  0x22   : > { %p949_p1 = pneg %p948_p10 }
  0x24   : > { %p956_p8 = pnand %p955_p4, %p949_p1 }
  0x26   : > { %959 = shalt.err (!%p956_p8)
}
  0x27   : > { %s1063_s12 = smov 256   ;;  %s1064_s13 = smov 16  }
  0x28   : > { %873 = dma.hbm_to_vmem [thread:$0]  (!%p1153_p11), %s1430_s3, 1024, %s1146_s25, [#allocation7], %s1063_s12, %s1063_s12, %s1064_s13  }
  0x29   : > { %p26_p1 = scmp.eq.s32.totalorder %s25_s29, 0  ;;  %p35_p2 = scmp.ne.s32.totalorder %s1056_s17, %s1052_s16 }
  0x2a   : > { %p36_p4 = scmp.eq.s32.totalorder %s1060_s18, 0  ;;  %p883_p6 = scmp.lt.s32.totalorder %s1060_s18, 2 }
  0x2b   : > { %s1192_s24 = scalar_select %p26_p1, %s1056_s17, %s28_s28  }
  0x2c   : > { %p37_p8 = por %p36_p4, %p35_p2  ;;  %p1439_p10 = scmp.eq.s32.totalorder %s1123_s19, 1 }
  0x2d   : > { %s173_s26 = sand.u32 1, %s1056_s17   ;;  %s806_s5 = sshll.u32 %s1060_s18, 9 }
  0x2e   : > { %p1196_p12 = por %p1439_p10, %p35_p2  ;;  %s783_s6 = sshll.u32 %s173_s26, 5 }
  0x2f   : > { %s1205_s9 = scalar_lea.hbm %s1427_s0, %s806_s5  ;;  %s177_s25 = scalar_lea.vmem [#allocation3], %s783_s6 }
  0x30   : > { %s184_s28 = sshll.u32 %s177_s25, 4  ;;  %p1207_p11 = pnand %p883_p6, %p37_p8  ;;  %s1211_s28 = int_to_ptr.vmem [resolvable:$true] %s184_s28 }
  0x31   : > { %s1213_s10 = scalar_lea.sflag [#allocation4], %s173_s26  ;;  %s960_s11 = scalar_lea.hbm %s1205_s9, 512 }
  0x32   : > { %p961_p13 = scmp.ne.s32.totalorder %s1205_s9, %s960_s11  ;;  %p962_p0 = pneg %p1207_p11 }
  0x33   : > { %s965_s5 = scalar_lea.hbm %s1427_s0, 1024  ;;  %p966_p7 = scmp.lt.u32.totalorder %s1205_s9, %s1427_s0 }
  0x34   : > { %p963_p3 = pnand %p962_p0, %p961_p13  ;;  %p967_p9 = scmp.lt.u32.totalorder %s965_s5, %s960_s11 }
  0x35   : > { %p969_p2 = scmp.lt.u32.totalorder %s960_s11, %s1205_s9 }
  0x36   : > { %p964_p5 = pneg %p963_p3  ;;  %p968_p1 = por %p967_p9, %p966_p7 }
  0x38   : > { %p970_p4 = por %p969_p2, %p968_p1 }
  0x3a   : > { %p971_p6 = pnand %p970_p4, %p964_p5 }
  0x3c   : > { %974 = shalt.err (!%p971_p6)
}
  0x3d   : > { %s975_s26 = scalar_lea.vmem %s1211_s28, 512  ;;  %s1065_s8 = smov [#allocation3]  }
  0x3e   : > { %p976_p8 = scmp.ne.s32.totalorder %s1211_s28, %s975_s26  ;;  %s980_s25 = sshll.u32 %s1065_s8, 4  ;;  %s981_s25 = int_to_ptr.vmem [resolvable:$false] %s980_s25 }
  0x3f   : > { %s982_s14 = scalar_lea.vmem %s981_s25, 1024  ;;  %p983_p3 = scmp.lt.s32.totalorder %s1211_s28, %s981_s25 }
  0x40   : > { %p978_p10 = pnand %p976_p8, %p962_p0  ;;  %p984_p7 = scmp.lt.s32.totalorder %s982_s14, %s975_s26 }
  0x42   : > { %p979_p13 = pneg %p978_p10  ;;  %p985_p9 = por %p984_p7, %p983_p3 }
  0x44   : > { %p986_p1 = pnand %p985_p9, %p979_p13 }
  0x46   : > { %989 = shalt.err (!%p986_p1)
}
  0x47   : > { %877 = dma.hbm_to_vmem [thread:$0]  (!%p1207_p11), %s1205_s9, 512, %s1211_s28, %s1213_s10, %s1063_s12, %s1063_s12, %s1064_s13  }
  0x48   : > { %p1442_p0 = scmp.ne.s32.totalorder %s1437_s23, 0 }
  0x49   : > { %s1247_s11 = sand.u32 (!%p1442_p0), 1, %s1052_s16   ;;  %p1443_p5 = scmp.ne.s32.totalorder (!%p1442_p0), %s1435_s21, 0 }
  0x4a   : > { %196 = sbr.rel (%p1442_p0) target bundleno = 637 (0x27d), region = 36  ;;  %s787_s20 = sshll.u32 (!%p1442_p0), %s1247_s11, 5 }
  0x4b   : > { %s199_s5 = scalar_lea.sflag (!%p1442_p0), [#allocation4], %s1247_s11  ;;  %s202_s6 = scalar_lea.vmem (!%p1442_p0), [#allocation3], %s787_s20 }
  0x51   : > { %1035 = dma.done.wait (%p1443_p5), %s199_s5, 512  }
  0x52   : > { %1037 = vsyncadd (%p1443_p5), %s199_s5, 4294966784  ;;  %p1444_p2 = scmp.eq.s32.totalorder %s1123_s19, 0 }
  0x54   : > { %1039 = dma.done.wait (%p1444_p2), [#allocation7], 1024   ;;  %p1445_p11 = pmov %p1444_p2 }
  0x55   : > { %v1066_v0 = vmov 0   ;;  %v235_v1 = vld [vmem:[%s1428_s1] sm:$0xff]  ;;  %v236_v2 = vld [vmem:[%s1428_s1 + $0x8] sm:$0xff]  ;;  %v233_v8 = vld [vmem:[%s202_s6 + $0x10] sm:$0xff]  ;;  %s1067_s21 = smov 17   ;;  %s1068_s28 = smov 16   ;;  %v259_v17 = vlaneseq }
  0x56   : > { %1041 = vsyncadd (%p1445_p11), [#allocation7], 4294966272  ;;  %931 = vset.pattern.permute.xlu0 %v1066_v0  ;;  %v231_v3 = vld [vmem:[%s202_s6] sm:$0xff]  ;;  %v232_v4 = vld [vmem:[%s202_s6 + $0x8] sm:$0xff]  ;;  %s1069_s29 = smov 15   ;;  %s1070_s10 = smov 1  }
  0x57   : > { %239 = vperm.xlu0 %931, %v235_v1   ;;  %v234_v9 = vld [vmem:[%s202_s6 + $0x18] sm:$0xff]  ;;  %s1071_s7 = smov 127   ;;  %s1072_s26 = smov 113   ;;  %v529_v15 = vld [vmem:[#allocation6 + $0x8] sm:$0xff]  ;;  %vm572_vm0 = vcmask 130048   ;;  %v269_v18 = vshrl.u32 %v259_v17, 7 }
  0x58   : > { %s1073_s8 = smov 112   ;;  %s1074_s25 = smov 111   ;;  %v533_v16 = vld [vmem:[#allocation6 + $0x28] sm:$0xff]  ;;  %797 = vmatprep.mubr.msk.f32.mxu0 %vm572_vm0, %v529_v15  ;;  %v1275_v20 = vand.u32 127, %v259_v17  ;;  %v266_v24 = vld [vmem:[%s1429_s2] sm:$0x3] }
  0x59   : > { %799 = vmatprep.mubr.msk.f32.mxu1 %vm572_vm0, %v533_v16  ;;  %v1277_v22 = vsub.s32 0, %v269_v18  ;;  %v1279_v23 = vsub.s32 1, %v269_v18  ;;  %v790_v39 = vld [vmem:[%s1429_s2 + $0x2] sm:$0x3]  ;;  %v791_v56 = vld [vmem:[%s1429_s2 + $0x4] sm:$0x3] }
  0x5a   : > { %vm261_vm1 = vcmp.lt.s32.totalorder %v1275_v20, 17  ;;  %vm294_vm2 = vcmp.lt.s32.totalorder %v1275_v20, 16  ;;  %vm328_vm3 = vcmp.lt.s32.totalorder %v1275_v20, 15  ;;  %vm362_vm4 = vcmp.lt.s32.totalorder %v1275_v20, 1  ;;  %s789_s20 = sshll.u32 %s1247_s11, 6  ;;  %s807_s23 = sshll.u32 %s1123_s19, 10 }
  0x5b   : > { %244 = vperm.xlu0 %931, %v236_v2   ;;  %v271_v27 = vrot.slane %v266_v24, %v1277_v22  ;;  %v275_v28 = vrot.slane %v266_v24, %v1279_v23  ;;  %v305_v44 = vrot.slane %v790_v39, %v1277_v22  ;;  %v309_v45 = vrot.slane %v790_v39, %v1279_v23  ;;  %s230_s5 = scalar_lea.vmem [#allocation8], %s789_s20  ;;  %s1382_s9 = scalar_lea.hbm %s1431_s4, %s807_s23 }
  0x5c   : > { %v339_v61 = vrot.slane %v791_v56, %v1277_v22  ;;  %v343_v62 = vrot.slane %v791_v56, %v1279_v23  ;;  %vm400_vm5 = vcmp.lt.s32.totalorder %v1275_v20, 127  ;;  %vm434_vm6 = vcmp.lt.s32.totalorder %v1275_v20, 113  ;;  %s696_s6 = sshll.u32 %s230_s5, 4  ;;  %s683_s19 = scalar_lea.sflag [#allocation5], %s1247_s11  ;;  %s1377_s6 = int_to_ptr.vmem [resolvable:$true] %s696_s6 }
  0x5d   : > { %vm468_vm7 = vcmp.lt.s32.totalorder %v1275_v20, 112  ;;  %vm502_vm8 = vcmp.lt.s32.totalorder %v1275_v20, 111 }
  0xd6   : > { %v240_v5 = vpop.permute.xlu0 %239 }
  0xd7   : > { %v247_v6 = vadd.f32 %v240_v5, %v231_v3  ;;  %v248_v7 = vadd.f32 %v240_v5, %v232_v4 }
  0xd9   : > { %255 = vrot.lane.b32.xlu0 %v248_v7, %s1067_s21  ;;  %251 = vrot.lane.b32.xlu1 %v247_v6, %s1067_s21 }
  0xda   : > { %v245_v10 = vpop.permute.xlu0 %244 }
  0xdb   : > { %v249_v11 = vadd.f32 %v245_v10, %v233_v8  ;;  %v250_v12 = vadd.f32 %v245_v10, %v234_v9  ;;  %v792_v9 = vld [vmem:[%s1429_s2 + $0x6] sm:$0x3] }
  0xdc   : > { %v373_v16 = vrot.slane %v792_v9, %v1277_v22  ;;  %v377_v17 = vrot.slane %v792_v9, %v1279_v23 }
  0xdd   : > { %286 = vrot.lane.b32.xlu0 %v247_v6, %s1068_s28  ;;  %253 = vrot.lane.b32.xlu1 %v249_v11, %s1067_s21  ;;  %v1266_v13 = vpack.c.bf16 %v250_v12, %v248_v7  ;;  %v1268_v14 = vpack.c.bf16 %v249_v11, %v247_v6 }
  0xe1   : > { %290 = vrot.lane.b32.xlu0 %v248_v7, %s1068_s28  ;;  %257 = vrot.lane.b32.xlu1 %v250_v12, %s1067_s21  ;;  %s990_s21 = scalar_lea.vmem %s1377_s6, 1024 }
  0xe2   : > { %p991_p4 = scmp.ne.s32.totalorder %s1377_s6, %s990_s21 }
  0xe4   : > { %p992_p6 = pnand %p991_p4, %p1196_p12 }
  0xe5   : > { %320 = vrot.lane.b32.xlu0 %v247_v6, %s1069_s29  ;;  %288 = vrot.lane.b32.xlu1 %v249_v11, %s1068_s28 }
  0xe6   : > { %p993_p8 = pneg %p992_p6 }
  0xe9   : > { %324 = vrot.lane.b32.xlu0 %v248_v7, %s1069_s29  ;;  %292 = vrot.lane.b32.xlu1 %v250_v12, %s1068_s28 }
  0xed   : > { %354 = vrot.lane.b32.xlu0 %v247_v6, %s1070_s10  ;;  %322 = vrot.lane.b32.xlu1 %v249_v11, %s1069_s29 }
  0xf1   : > { %358 = vrot.lane.b32.xlu0 %v248_v7, %s1070_s10  ;;  %326 = vrot.lane.b32.xlu1 %v250_v12, %s1069_s29  ;;  %s1075_s29 = smov [#allocation8]  }
  0xf5   : > { %392 = vrot.lane.b32.xlu0 %v247_v6, %s1071_s7  ;;  %356 = vrot.lane.b32.xlu1 %v249_v11, %s1070_s10 }
  0xf9   : > { %396 = vrot.lane.b32.xlu0 %v248_v7, %s1071_s7  ;;  %360 = vrot.lane.b32.xlu1 %v250_v12, %s1070_s10  ;;  %s994_s10 = sshll.u32 %s1075_s29, 4  ;;  %s995_s10 = int_to_ptr.vmem [resolvable:$false] %s994_s10 }
  0xfa   : > { %p997_p10 = scmp.lt.s32.totalorder %s1377_s6, %s995_s10 }
  0xfd   : > { %426 = vrot.lane.b32.xlu0 %v247_v6, %s1072_s26  ;;  %394 = vrot.lane.b32.xlu1 %v249_v11, %s1071_s7 }
 0x101   : > { %430 = vrot.lane.b32.xlu0 %v248_v7, %s1072_s26  ;;  %398 = vrot.lane.b32.xlu1 %v250_v12, %s1071_s7  ;;  %s996_s7 = scalar_lea.vmem %s995_s10, 2048 }
 0x102   : > { %p998_p13 = scmp.lt.s32.totalorder %s996_s7, %s990_s21 }
 0x104   : > { %p999_p3 = por %p998_p13, %p997_p10 }
 0x105   : > { %460 = vrot.lane.b32.xlu0 %v247_v6, %s1073_s8  ;;  %428 = vrot.lane.b32.xlu1 %v249_v11, %s1072_s26 }
 0x106   : > { %p1000_p7 = pnand %p999_p3, %p993_p8 }
 0x109   : > { %464 = vrot.lane.b32.xlu0 %v248_v7, %s1073_s8  ;;  %432 = vrot.lane.b32.xlu1 %v250_v12, %s1072_s26 }
 0x10d   : > { %494 = vrot.lane.b32.xlu0 %v247_v6, %s1074_s25  ;;  %462 = vrot.lane.b32.xlu1 %v249_v11, %s1073_s8 }
 0x111   : > { %498 = vrot.lane.b32.xlu0 %v248_v7, %s1074_s25  ;;  %466 = vrot.lane.b32.xlu1 %v250_v12, %s1073_s8 }
 0x115   : > { %496 = vrot.lane.b32.xlu1 %v249_v11, %s1074_s25 }
 0x119   : > { %500 = vrot.lane.b32.xlu1 %v250_v12, %s1074_s25 }
 0x14b   : > { %v256_v19 = vpop.permute.xlu0 %255  ;;  %v252_v21 = vpop.permute.xlu1 %251 }
 0x14c   : > { %v262_v29 = vsel %vm261_vm1, %v252_v21, %v256_v19  ;;  %v264_v30 = vsel %vm261_vm1, %v256_v19, %v252_v21 }
 0x14d   : > { %v278_v35 = vmul.f32 %v271_v27, %v264_v30  ;;  %v279_v36 = vmul.f32 %v275_v28, %v262_v29 }
 0x14f   : > { %v287_v25 = vpop.permute.xlu0 %286  ;;  %v254_v26 = vpop.permute.xlu1 %253 }
 0x153   : > { %v291_v31 = vpop.permute.xlu0 %290  ;;  %v258_v32 = vpop.permute.xlu1 %257 }
 0x154   : > { %v263_v33 = vsel %vm261_vm1, %v254_v26, %v258_v32  ;;  %v265_v34 = vsel %vm261_vm1, %v258_v32, %v254_v26  ;;  %v295_v46 = vsel %vm294_vm2, %v287_v25, %v291_v31  ;;  %v297_v47 = vsel %vm294_vm2, %v291_v31, %v287_v25  ;;  %v793_v31 = vld [vmem:[%s1429_s2 + $0xa] sm:$0x3] }
 0x155   : > { %v280_v37 = vmul.f32 %v271_v27, %v265_v34  ;;  %v281_v38 = vmul.f32 %v275_v28, %v263_v33  ;;  %v312_v52 = vmul.f32 %v305_v44, %v297_v47  ;;  %v313_v53 = vmul.f32 %v309_v45, %v295_v46 }
 0x157   : > { %v321_v40 = vpop.permute.xlu0 %320  ;;  %v289_v41 = vpop.permute.xlu1 %288  ;;  %v808_v42 = vpack.c.bf16 %v281_v38, %v279_v36  ;;  %v810_v43 = vpack.c.bf16 %v280_v37, %v278_v35  ;;  %v411_v36 = vrot.slane %v793_v31, %v1277_v22  ;;  %v415_v37 = vrot.slane %v793_v31, %v1279_v23 }
 0x159   : > { %809 = vmatprep.subr.bf16.mxu0 %v808_v42  ;;  %844 = vmatprep.subr.bf16.mxu1 %v808_v42 }
 0x15a   : > { %811 = vmatpush1.bf16.msra.mxu0 %v810_v43  ;;  %853 = vmatpush1.bf16.msra.mxu1 %v810_v43 }
 0x15b   : > { %v325_v48 = vpop.permute.xlu0 %324  ;;  %v293_v49 = vpop.permute.xlu1 %292 }
 0x15c   : > { %v296_v50 = vsel %vm294_vm2, %v289_v41, %v293_v49  ;;  %v298_v51 = vsel %vm294_vm2, %v293_v49, %v289_v41  ;;  %v329_v63 = vsel %vm328_vm3, %v321_v40, %v325_v48  ;;  %v331_v0 = vsel %vm328_vm3, %v325_v48, %v321_v40  ;;  %v794_v48 = vld [vmem:[%s1429_s2 + $0xc] sm:$0x3] }
 0x15d   : > { %v314_v54 = vmul.f32 %v305_v44, %v298_v51  ;;  %v315_v55 = vmul.f32 %v309_v45, %v296_v50  ;;  %v346_v5 = vmul.f32 %v339_v61, %v331_v0  ;;  %v347_v6 = vmul.f32 %v343_v62, %v329_v63  ;;  %v795_v63 = vld [vmem:[%s1429_s2 + $0xe] sm:$0x3] }
 0x15f   : > { %v355_v57 = vpop.permute.xlu0 %354  ;;  %v323_v58 = vpop.permute.xlu1 %322  ;;  %v812_v59 = vpack.c.bf16 %v315_v55, %v313_v53  ;;  %v814_v60 = vpack.c.bf16 %v314_v54, %v312_v52  ;;  %v445_v52 = vrot.slane %v794_v48, %v1277_v22  ;;  %v449_v53 = vrot.slane %v794_v48, %v1279_v23 }
 0x161   : > { %813 = vmatprep.subr.bf16.mxu0 %v812_v59  ;;  %845 = vmatprep.subr.bf16.mxu1 %v812_v59 }
 0x162   : > { %815 = vmatpush1.bf16.msra.mxu0 %v814_v60  ;;  %854 = vmatpush1.bf16.msra.mxu1 %v814_v60 }
 0x163   : > { %v359_v1 = vpop.permute.xlu0 %358  ;;  %v327_v2 = vpop.permute.xlu1 %326 }
 0x164   : > { %v330_v3 = vsel %vm328_vm3, %v323_v58, %v327_v2  ;;  %v332_v4 = vsel %vm328_vm3, %v327_v2, %v323_v58  ;;  %v363_v18 = vsel %vm362_vm4, %v355_v57, %v359_v1  ;;  %v365_v19 = vsel %vm362_vm4, %v359_v1, %v355_v57 }
 0x165   : > { %v348_v7 = vmul.f32 %v339_v61, %v332_v4  ;;  %v349_v8 = vmul.f32 %v343_v62, %v330_v3  ;;  %v380_v27 = vmul.f32 %v373_v16, %v365_v19  ;;  %v381_v28 = vmul.f32 %v377_v17, %v363_v18 }
 0x166   : > { %v479_v3 = vrot.slane %v795_v63, %v1277_v22  ;;  %v483_v4 = vrot.slane %v795_v63, %v1279_v23 }
 0x167   : > { %v393_v10 = vpop.permute.xlu0 %392  ;;  %v357_v11 = vpop.permute.xlu1 %356  ;;  %v816_v12 = vpack.c.bf16 %v349_v8, %v347_v6  ;;  %v818_v15 = vpack.c.bf16 %v348_v7, %v346_v5 }
 0x169   : > { %817 = vmatprep.subr.bf16.mxu0 %v816_v12  ;;  %846 = vmatprep.subr.bf16.mxu1 %v816_v12 }
 0x16a   : > { %819 = vmatpush1.bf16.msra.mxu0 %v818_v15  ;;  %855 = vmatpush1.bf16.msra.mxu1 %v818_v15 }
 0x16b   : > { %v397_v21 = vpop.permute.xlu0 %396  ;;  %v361_v24 = vpop.permute.xlu1 %360 }
 0x16c   : > { %v364_v25 = vsel %vm362_vm4, %v357_v11, %v361_v24  ;;  %v366_v26 = vsel %vm362_vm4, %v361_v24, %v357_v11  ;;  %v401_v38 = vsel %vm400_vm5, %v393_v10, %v397_v21  ;;  %v403_v39 = vsel %vm400_vm5, %v397_v21, %v393_v10 }
 0x16d   : > { %v382_v29 = vmul.f32 %v373_v16, %v366_v26  ;;  %v383_v30 = vmul.f32 %v377_v17, %v364_v25  ;;  %v418_v44 = vmul.f32 %v411_v36, %v401_v38  ;;  %v419_v45 = vmul.f32 %v415_v37, %v403_v39  ;;  %v796_v17 = vld [vmem:[%s1429_s2 + $0x10] sm:$0x3]  ;;  %v535_v38 = vld [vmem:[#allocation6 + $0x38] sm:$0xff] }
 0x16e   : > { %v513_v25 = vrot.slane %v796_v17, %v1277_v22  ;;  %v517_v26 = vrot.slane %v796_v17, %v1279_v23  ;;  %v528_v22 = vld [vmem:[#allocation6] sm:$0xff]  ;;  %v530_v39 = vld [vmem:[#allocation6 + $0x10] sm:$0xff] }
 0x16f   : > { %v427_v32 = vpop.permute.xlu0 %426  ;;  %v395_v33 = vpop.permute.xlu1 %394  ;;  %v820_v34 = vpack.c.bf16 %v383_v30, %v381_v28  ;;  %v822_v35 = vpack.c.bf16 %v382_v29, %v380_v27  ;;  %v532_v23 = vld [vmem:[#allocation6 + $0x20] sm:$0xff] }
 0x171   : > { %821 = vmatprep.subr.bf16.mxu0 %v820_v34  ;;  %847 = vmatprep.subr.bf16.mxu1 %v820_v34 }
 0x172   : > { %823 = vmatpush1.bf16.msra.mxu0 %v822_v35  ;;  %856 = vmatpush1.bf16.msra.mxu1 %v822_v35 }
 0x173   : > { %v431_v40 = vpop.permute.xlu0 %430  ;;  %825 = vmatprep.subr.bf16.mxu0 %v1266_v13  ;;  %848 = vmatprep.subr.bf16.mxu1 %v1266_v13  ;;  %v399_v41 = vpop.permute.xlu1 %398 }
 0x174   : > { %v402_v42 = vsel %vm400_vm5, %v395_v33, %v399_v41  ;;  %v404_v43 = vsel %vm400_vm5, %v399_v41, %v395_v33  ;;  %v435_v54 = vsel %vm434_vm6, %v427_v32, %v431_v40  ;;  %v437_v55 = vsel %vm434_vm6, %v431_v40, %v427_v32  ;;  %v534_v40 = vld [vmem:[#allocation6 + $0x30] sm:$0xff] }
 0x175   : > { %v420_v46 = vmul.f32 %v411_v36, %v402_v42  ;;  %v421_v47 = vmul.f32 %v415_v37, %v404_v43  ;;  %v452_v59 = vmul.f32 %v445_v52, %v435_v54  ;;  %v453_v60 = vmul.f32 %v449_v53, %v437_v55  ;;  %v531_v37 = vld [vmem:[#allocation6 + $0x18] sm:$0xff] }
 0x176   : > { %827 = vmatpush1.bf16.msra.mxu0 %v1268_v14  ;;  %857 = vmatpush1.bf16.msra.mxu1 %v1268_v14 }
 0x177   : > { %v461_v13 = vpop.permute.xlu0 %460  ;;  %v429_v49 = vpop.permute.xlu1 %428  ;;  %v828_v50 = vpack.c.bf16 %v421_v47, %v419_v45  ;;  %v830_v51 = vpack.c.bf16 %v420_v46, %v418_v44 }
 0x179   : > { %829 = vmatprep.subr.bf16.mxu0 %v828_v50  ;;  %849 = vmatprep.subr.bf16.mxu1 %v828_v50 }
 0x17a   : > { %831 = vmatpush1.bf16.msra.mxu0 %v830_v51  ;;  %858 = vmatpush1.bf16.msra.mxu1 %v830_v51 }
 0x17b   : > { %v465_v14 = vpop.permute.xlu0 %464  ;;  %v433_v56 = vpop.permute.xlu1 %432 }
 0x17c   : > { %v436_v57 = vsel %vm434_vm6, %v429_v49, %v433_v56  ;;  %v438_v58 = vsel %vm434_vm6, %v433_v56, %v429_v49  ;;  %v469_v6 = vsel %vm468_vm7, %v461_v13, %v465_v14  ;;  %v471_v7 = vsel %vm468_vm7, %v465_v14, %v461_v13 }
 0x17d   : > { %v454_v61 = vmul.f32 %v445_v52, %v436_v57  ;;  %v455_v62 = vmul.f32 %v449_v53, %v438_v58  ;;  %v486_v11 = vmul.f32 %v479_v3, %v469_v6  ;;  %v487_v12 = vmul.f32 %v483_v4, %v471_v7 }
 0x17f   : > { %v463_v0 = vpop.permute.xlu1 %462  ;;  %v832_v1 = vpack.c.bf16 %v455_v62, %v453_v60  ;;  %v834_v2 = vpack.c.bf16 %v454_v61, %v452_v59  ;;  %v495_v5 = vpop.permute.xlu0 %494 }
 0x181   : > { %833 = vmatprep.subr.bf16.mxu0 %v832_v1  ;;  %850 = vmatprep.subr.bf16.mxu1 %v832_v1 }
 0x182   : > { %835 = vmatpush1.bf16.msra.mxu0 %v834_v2  ;;  %859 = vmatpush1.bf16.msra.mxu1 %v834_v2 }
 0x183   : > { %v467_v8 = vpop.permute.xlu1 %466  ;;  %v499_v18 = vpop.permute.xlu0 %498 }
 0x184   : > { %v470_v9 = vsel %vm468_vm7, %v463_v0, %v467_v8  ;;  %v472_v10 = vsel %vm468_vm7, %v467_v8, %v463_v0  ;;  %v503_v27 = vsel %vm502_vm8, %v495_v5, %v499_v18  ;;  %v505_v28 = vsel %vm502_vm8, %v499_v18, %v495_v5 }
 0x185   : > { %v488_v15 = vmul.f32 %v479_v3, %v470_v9  ;;  %v489_v16 = vmul.f32 %v483_v4, %v472_v10  ;;  %v520_v32 = vmul.f32 %v513_v25, %v503_v27  ;;  %v521_v33 = vmul.f32 %v517_v26, %v505_v28 }
 0x187   : > { %v497_v19 = vpop.permute.xlu1 %496  ;;  %v836_v21 = vpack.c.bf16 %v489_v16, %v487_v12  ;;  %v838_v24 = vpack.c.bf16 %v488_v15, %v486_v11 }
 0x189   : > { %837 = vmatprep.subr.bf16.mxu0 %v836_v21  ;;  %851 = vmatprep.subr.bf16.mxu1 %v836_v21 }
 0x18a   : > { %839 = vmatpush1.bf16.msra.mxu0 %v838_v24  ;;  %860 = vmatpush1.bf16.msra.mxu1 %v838_v24 }
 0x18b   : > { %v501_v29 = vpop.permute.xlu1 %500 }
 0x18c   : > { %v504_v30 = vsel %vm502_vm8, %v497_v19, %v501_v29  ;;  %v506_v31 = vsel %vm502_vm8, %v501_v29, %v497_v19 }
 0x18d   : > { %v522_v20 = vmul.f32 %v513_v25, %v504_v30  ;;  %v523_v34 = vmul.f32 %v517_v26, %v506_v31 }
 0x18f   : > { %v840_v35 = vpack.c.bf16 %v523_v34, %v521_v33  ;;  %v842_v36 = vpack.c.bf16 %v522_v20, %v520_v32 }
 0x191   : > { %841 = vmatprep.subr.bf16.mxu0 %v840_v35  ;;  %852 = vmatprep.subr.bf16.mxu1 %v840_v35 }
 0x192   : > { %843 = vmatpush1.bf16.msra.mxu0 %v842_v36  ;;  %861 = vmatpush1.bf16.msra.mxu1 %v842_v36 }
 0x195   : > { %650 = vmatmul.mubr.f32.vlgmr.msra.gmra.mrb[0].mxu0 %v528_v22  ;;  %662 = vmatmul.mubr.f32.vlgmr.msra.gmra.mrb[0].mxu1 %v532_v23 }
 0x196   : > { %798 = vmatprep.mubr.msk.f32.mxu0 %vm572_vm0, %v531_v37  ;;  %800 = vmatprep.mubr.msk.f32.mxu1 %vm572_vm0, %v535_v38 }
 0x199   : > { %656 = vmatmul.mubr.f32.gmra.mrb[2].mxu0 %v530_v39  ;;  %668 = vmatmul.mubr.f32.gmra.mrb[2].mxu1 %v534_v40 }
 0x268   : > { %v651_v41 = vpop.f32.mrb[0].mxu0  ;;  %v663_v42 = vpop.f32.mrb[0].mxu1 }
 0x269   : > { %674 = vst [vmem:[%s230_s5] sm:$0xff] %v651_v41  ;;  %678 = vst [vmem:[%s230_s5 + $0x20] sm:$0xff] %v663_v42  ;;  %v653_v43 = vpop.f32.mrb[1].mxu0  ;;  %v665_v44 = vpop.f32.mrb[1].mxu1 }
 0x26a   : > { %675 = vst [vmem:[%s230_s5 + $0x8] sm:$0xff] %v653_v43  ;;  %679 = vst [vmem:[%s230_s5 + $0x28] sm:$0xff] %v665_v44 }
 0x26c   : > { %v657_v45 = vpop.f32.mrb[2].mxu0  ;;  %v669_v46 = vpop.f32.mrb[2].mxu1 }
 0x26d   : > { %676 = vst [vmem:[%s230_s5 + $0x10] sm:$0xff] %v657_v45  ;;  %680 = vst [vmem:[%s230_s5 + $0x30] sm:$0xff] %v669_v46  ;;  %v659_v47 = vpop.f32.mrb[3].mxu0  ;;  %v671_v48 = vpop.f32.mrb[3].mxu1 }
 0x26e   : > { %677 = vst [vmem:[%s230_s5 + $0x18] sm:$0xff] %v659_v47  ;;  %681 = vst [vmem:[%s230_s5 + $0x38] sm:$0xff] %v671_v48 }
 0x26f   : > { %1003 = shalt.err (!%p1000_p7)
}
 0x270   : > { %s1004_s26 = scalar_lea.hbm %s1382_s9, 1024  ;;  %s1008_s14 = scalar_lea.hbm %s1431_s4, 2048 }
 0x271   : > { %p1005_p9 = scmp.ne.s32.totalorder %s1382_s9, %s1004_s26  ;;  %p1009_p5 = scmp.lt.u32.totalorder %s1382_s9, %s1431_s4 }
 0x272   : > { %p1010_p2 = scmp.lt.u32.totalorder %s1008_s14, %s1004_s26  ;;  %p1012_p4 = scmp.lt.u32.totalorder %s1004_s26, %s1382_s9 }
 0x273   : > { %p1006_p1 = pnand %p1005_p9, %p1196_p12 }
 0x274   : > { %p1011_p11 = por %p1010_p2, %p1009_p5 }
 0x275   : > { %p1007_p0 = pneg %p1006_p1 }
 0x276   : > { %p1013_p6 = por %p1012_p4, %p1011_p11 }
 0x278   : > { %p1014_p8 = pnand %p1013_p6, %p1007_p0 }
 0x27a   : > { %1017 = shalt.err (!%p1014_p8)
}
 0x27b   : > { %s1076_s23 = smov 256  }
 0x27c   : > { %868 = dma.vmem_to_hbm [thread:$0]  (%p1196_p12), %s1377_s6, 1024, %s1382_s9, %s683_s19, %s1076_s23, %s1076_s23, %s1068_s28  }
 0x27d PF: > { %s711_s12 = sand.u32 1, %s1048_s15   ;;  %p1446_p10 = scmp.ne.s32.totalorder %s1436_s22, 0 }
 0x27e   : > { %p1447_p13 = scmp.ge.s32.totalorder %s1060_s18, 2  ;;  %s712_s13 = scalar_lea.sflag [#allocation5], %s711_s12 }
 0x280   : > { %p879_p3 = pnand %p1447_p13, %p1446_p10 }
 0x282   : > { %1043 = dma.done.wait (!%p879_p3), %s712_s13, 1024  }
 0x283   : > { %1045 = vsyncadd (!%p879_p3), %s712_s13, 4294966272  ;;  %p18_p7 = scmp.ge.s32.totalorder %s1158_s27, 4   ;;  %s1448_s15 = smov %s1052_s16 }
 0x284   : > { %s1449_s16 = smov %s1056_s17  ;;  %s1450_s17 = smov %s1192_s24 }
 0x285   : > { %s1451_s18 = smov %s1158_s27  ;;  %20 = sbr.rel (!%p18_p7) target bundleno = 6 (0x6), region = 92 }
 0x28c   :  { %717 = vsyncpa [#allocation4], 1 }
 0x28d   :  { %719 = vsyncpa [#allocation4 + $0x1], 1 }
 0x28e   :  { %720 = vsyncpa [#allocation7], 1 }
 0x28f   :  { %721 = vsyncpa [#allocation5], 1 }
 0x290   :  { %723 = vsyncpa [#allocation5 + $0x1], 1 }

</bundles_post_ra>
